<compile_context>
chip_gen: v7x
topology: tpu7x:2x2x1
jax: 0.10.0
libtpu: 0.0.40
codegen_flags: <defaults>
</compile_context>

<pallas_src>
import functools

import jax
import jax.numpy as jnp
from jax import lax
from jax.experimental import pallas as pl
from jax.experimental.pallas import tpu as pltpu


def _mha_kernel(x_ref, wq_ref, wkv_ref, wo_ref, bo_ref, o_ref, kv_ref, acc_ref, *,
                heads_per_group, d_attn, d_model, q_tile, cross_attention,
                compute_dtype, weights_resident, fuse_out_proj):
    g = pl.program_id(1)
    qt = pl.program_id(2)
    n_groups = pl.num_programs(1)
    n_qt = pl.num_programs(2)

    hg, A, D, Tq = heads_per_group, d_attn, d_model, q_tile
    kv_off = hg * A
    S = x_ref.shape[0]

    # Weight group selector: dynamic group index when weights are VMEM-resident
    # (block leading dim == G), static 0 when streamed (block leading dim == 1).
    widx = g if weights_resident else 0

    # ---- K/V projection for the whole sequence & all heads of the group: once per (b, g).
    @pl.when(qt == 0)
    def _():
        kv_ref[...] = jnp.dot(x_ref[...], wkv_ref[widx],
                              preferred_element_type=jnp.float32).astype(kv_ref.dtype)

    # ---- Q projection for this query tile; 1/sqrt(A) folded into q ([Tq,A] mul).
    q_start = qt * Tq
    if Tq & (Tq - 1) == 0:                       # power-of-two tile -> alignment hint
        q_start = pl.multiple_of(q_start, Tq)
    x_tile = x_ref[pl.ds(q_start, Tq), :]
    scale = 1.0 / (A ** 0.5)
    q_all = (jnp.dot(x_tile, wq_ref[widx], preferred_element_type=jnp.float32)
             * scale).astype(compute_dtype)      # [Tq, hg*A]

    # Causal mask hoisted out of the per-head loop (JAX does not CSE broadcast_in_dim).
    if cross_attention:
        row = q_start + lax.broadcasted_iota(jnp.int32, (Tq, S), 0)
        col = lax.broadcasted_iota(jnp.int32, (Tq, S), 1)
        keep = col <= row

    wo_group = wo_ref[widx]                      # [hg*D, D], loaded once per step

    # TODO(synk): optional `cross` (separate key source) and per-token `mask` arguments
    # of the PyTorch module are not implemented (forward with cross=None, mask=None).
    contrib = None
    head_outs = []
    for hh in range(hg):
        q = q_all[:, hh * A:(hh + 1) * A]                        # [Tq, A]
        k = kv_ref[:, hh * A:(hh + 1) * A]                       # [S, A]
        v = kv_ref[:, kv_off + hh * D:kv_off + (hh + 1) * D]     # [S, D]

        # logits = q @ k^T without materializing k.T (contract the last dims).
        logits = lax.dot_general(q, k, (((1,), (1,)), ((), ())),
                                 preferred_element_type=jnp.float32)   # [Tq, S]
        if cross_attention:
            logits = jnp.where(keep, logits, -jnp.inf)

        m = jnp.max(logits, axis=-1, keepdims=True)
        p = jnp.exp(logits - m)
        denom = jnp.sum(p, axis=-1, keepdims=True)
        recip = pl.reciprocal(denom, approx=False)               # exact, [Tq,1]: cheap
        pv = jnp.dot(p.astype(compute_dtype), v,
                     preferred_element_type=jnp.float32)         # [Tq, D]
        head_out = pv * recip                                    # deferred softmax norm

        if fuse_out_proj:
            head_outs.append(head_out.astype(compute_dtype))
        else:
            # Per-head output-projection accumulate: avoids the lane-axis concat when
            # D is not a multiple of 128 and keeps live ranges short.
            t = jnp.dot(head_out.astype(compute_dtype),
                        wo_group[hh * D:(hh + 1) * D, :],
                        preferred_element_type=jnp.float32)      # [Tq, D]
            contrib = t if contrib is None else contrib + t

    if fuse_out_proj:
        group_out = head_outs[0] if hg == 1 else jnp.concatenate(head_outs, axis=-1)
        contrib = jnp.dot(group_out, wo_group, preferred_element_type=jnp.float32)

    q_slice = pl.ds(q_start, Tq)

    @pl.when(g == 0)
    def _():
        acc_ref[q_slice, :] = contrib

    @pl.when(g > 0)
    def _():
        acc_ref[q_slice, :] = acc_ref[q_slice, :] + contrib

    @pl.when(jnp.logical_and(g == n_groups - 1, qt == n_qt - 1))
    def _():
        # Single store per batch; bias added once, in f32.
        o_ref[...] = (acc_ref[...] + bo_ref[...]).astype(o_ref.dtype)


def _vmem_capacity_bytes():
    try:
        info = pltpu.get_tpu_info()
        cap = getattr(info, "vmem_capacity_bytes", None)
        if cap:
            return int(cap)
    except Exception:
        pass
    return 64 << 20   # conservative fallback (v7x physical VMEM)


def _pick_q_tile(seq_len, max_tile=512):
    """Largest divisor of seq_len <= max_tile (prefer multiples of 8)."""
    if seq_len <= max_tile:
        return seq_len
    divs = [t for t in range(1, max_tile + 1) if seq_len % t == 0]
    aligned = [t for t in divs if t % 8 == 0]
    return (aligned or divs)[-1]


def multi_head_attention(x, wq, wk, wv, wo_full, bo, *, cross_attention=False,
                         compute_dtype=jnp.bfloat16, heads_per_group=None,
                         q_tile=None, out_dtype=None):
    """
    x       : [B, S, D]  activations
    wq, wk  : [H, A, D]  per-head q/k Linear weights (torch layout: [out, in])
    wv      : [H, D, D]  per-head v Linear weights
    wo_full : [D, H*D]   output Linear weight (torch layout)
    bo      : [1, D] or [D]  output Linear bias
    """
    B, S, D = x.shape
    H, A, _ = wq.shape
    if out_dtype is None:
        out_dtype = x.dtype

    w_item = jnp.dtype(compute_dtype).itemsize
    out_item = jnp.dtype(out_dtype).itemsize

    # ---- generation-aware VMEM budget (≈54 MiB on v7x, ≈108 MiB on v5e/v6e) ----
    budget = int(_vmem_capacity_bytes() * 0.85)

    # ---- head grouping (≤512 fused KV lanes) and query-tile size ----
    divisors = [d for d in range(1, H + 1) if H % d == 0]
    if heads_per_group is None:
        fitting = [d for d in divisors if d * (A + D) <= 512]
        heads_per_group = fitting[-1] if fitting else 1
    hg = heads_per_group
    assert H % hg == 0, "heads_per_group must divide n_heads"

    Tq = _pick_q_tile(S) if q_tile is None else q_tile
    assert S % Tq == 0, "q_tile must divide the sequence length"

    # Weights VMEM-resident only when small relative to the budget.
    total_w_bytes = (H * D * A + H * D * (A + D) + H * D * D) * w_item
    weights_resident = 2 * total_w_bytes <= budget // 4

    def est(hg_):
        """Corrected per-step working-set estimate (bytes)."""
        kvw = hg_ * (A + D)
        per_group_w = (D * hg_ * A + D * kvw + hg_ * D * D) * w_item
        w_term = 2 * per_group_w * ((H // hg_) if weights_resident else 1)
        return (2 * S * D * w_item                      # x block (double-buffered)
                + 2 * S * D * out_item                  # output block
                + S * D * 4                             # f32 accumulator scratch
                + S * kvw * (w_item + 4)                # kv scratch + f32 matmul result
                + w_term                                # weights
                + (5 if cross_attention else 3) * Tq * S * 4   # logits, p, temps, iotas
                + 2 * Tq * hg_ * A * 4                  # q_all f32 + cast copy
                + (hg_ + 2) * Tq * D * 4                # head outs / pv / contrib
                + Tq * hg_ * D * w_item)                # concat buffer (fused path)

    while hg > 1 and est(hg) > int(0.6 * budget):
        hg = max(d for d in divisors if d < hg)
    G = H // hg
    per_kv = hg * (A + D)
    vmem_limit = int(min(max(32 << 20, int(1.4 * est(hg))), budget))

    # ---- one-time host-side weight packing (contraction dim first, no in-kernel .T) ----
    def pack(w):                                    # [H, out, D] -> [G, D, hg*out]
        out_w = w.shape[1]
        return (jnp.swapaxes(w, 1, 2)
                   .reshape(G, hg, D, out_w)
                   .transpose(0, 2, 1, 3)
                   .reshape(G, D, hg * out_w))

    wq_p = pack(wq)                                               # [G, D, hg*A]
    wkv_p = jnp.concatenate([pack(wk), pack(wv)], axis=-1)        # [G, D, hg*(A+D)]
    wo_p = jnp.swapaxes(wo_full, 0, 1).reshape(G, hg * D, D)      # [G, hg*D, D]
    bo2 = jnp.reshape(bo, (1, D)).astype(jnp.float32)

    x_c = x.astype(compute_dtype)
    wq_c = wq_p.astype(compute_dtype)
    wkv_c = wkv_p.astype(compute_dtype)
    wo_c = wo_p.astype(compute_dtype)

    if weights_resident:
        wq_spec = pl.BlockSpec((G, D, hg * A), lambda b, g, t: (0, 0, 0))
        wkv_spec = pl.BlockSpec((G, D, per_kv), lambda b, g, t: (0, 0, 0))
        wo_spec = pl.BlockSpec((G, hg * D, D), lambda b, g, t: (0, 0, 0))
    else:
        wq_spec = pl.BlockSpec((1, D, hg * A), lambda b, g, t: (g, 0, 0))
        wkv_spec = pl.BlockSpec((1, D, per_kv), lambda b, g, t: (g, 0, 0))
        wo_spec = pl.BlockSpec((1, hg * D, D), lambda b, g, t: (g, 0, 0))

    kernel = functools.partial(
        _mha_kernel, heads_per_group=hg, d_attn=A, d_model=D, q_tile=Tq,
        cross_attention=cross_attention, compute_dtype=compute_dtype,
        weights_resident=weights_resident, fuse_out_proj=(D % 128 == 0))

    return pl.pallas_call(
        kernel,
        out_shape=jax.ShapeDtypeStruct((B, S, D), out_dtype),
        grid_spec=pltpu.PrefetchScalarGridSpec(
            num_scalar_prefetch=0,
            grid=(B, G, S // Tq),
            in_specs=[
                pl.BlockSpec((None, S, D), lambda b, g, t: (b, 0, 0)),   # x
                wq_spec,                                                  # packed Wq
                wkv_spec,                                                 # packed [Wk|Wv]
                wo_spec,                                                  # grouped Wo
                pl.BlockSpec((1, D), lambda b, g, t: (0, 0)),             # bias
            ],
            out_specs=pl.BlockSpec((None, S, D), lambda b, g, t: (b, 0, 0)),
            scratch_shapes=[
                pltpu.VMEM((S, per_kv), compute_dtype),   # K/V for one head group
                pltpu.VMEM((S, D), jnp.float32),          # f32 output accumulator
            ],
        ),
        compiler_params=pltpu.CompilerParams(
            dimension_semantics=("parallel", "arbitrary", "arbitrary"),
            vmem_limit_bytes=vmem_limit),
    )(x_c, wq_c, wkv_c, wo_c, bo2)


def _reference(x, wq, wk, wv, wo_full, bo, *, cross_attention=False):
    """Pure-JAX mirror of the PyTorch forward (cross=None, mask=None)."""
    H, A, _ = wq.shape
    S = x.shape[1]
    heads = []
    for h in range(H):
        q = x @ wq[h].T
        k = x @ wk[h].T
        v = x @ wv[h].T
        logits = q @ jnp.swapaxes(k, -1, -2)
        if cross_attention:
            causal = jnp.tril(jnp.ones((S, S), dtype=bool))
            logits = jnp.where(causal[None], logits, -jnp.inf)
        attn = jax.nn.softmax(logits / (A ** 0.5), axis=-1)
        heads.append(attn @ v)
    multi = jnp.concatenate(heads, axis=-1)              # [B, S, H*D]
    return multi @ wo_full.T + jnp.reshape(bo, (1, -1))  # [B, S, D]


if __name__ == "__main__":
    d_model, d_attn, n_heads = 32, 16, 4
    B, S = 2, 8

    key = jax.random.PRNGKey(0)
    kx, kq, kk, kv, ko, kb = jax.random.split(key, 6)

    x = jax.random.normal(kx, (B, S, d_model), dtype=jnp.float32)
    # torch nn.Linear weight layout: [out_features, in_features]
    wq = 0.05 * jax.random.normal(kq, (n_heads, d_attn, d_model), dtype=jnp.float32)
    wk = 0.05 * jax.random.normal(kk, (n_heads, d_attn, d_model), dtype=jnp.float32)
    wv = 0.05 * jax.random.normal(kv, (n_heads, d_model, d_model), dtype=jnp.float32)
    wo_full = 0.05 * jax.random.normal(ko, (d_model, d_model * n_heads), dtype=jnp.float32)
    bo = 0.05 * jax.random.normal(kb, (1, d_model), dtype=jnp.float32)

    ref = _reference(x, wq, wk, wv, wo_full, bo, cross_attention=False)
    ref_causal = _reference(x, wq, wk, wv, wo_full, bo, cross_attention=True)

    # Exact f32 path — tight tolerance against the torch-equivalent reference.
    out_f32 = jax.block_until_ready(
        multi_head_attention(x, wq, wk, wv, wo_full, bo, compute_dtype=jnp.float32))
    assert out_f32.shape == x.shape
    err = jnp.max(jnp.abs(out_f32 - ref))
    assert jnp.allclose(out_f32, ref, atol=1e-4, rtol=1e-4), f"f32 max err {err}"

    # Causal-mask ("cross_attention") path, f32.
    out_causal = jax.block_until_ready(
        multi_head_attention(x, wq, wk, wv, wo_full, bo, cross_attention=True,
                             compute_dtype=jnp.float32))
    err_c = jnp.max(jnp.abs(out_causal - ref_causal))
    assert jnp.allclose(out_causal, ref_causal, atol=1e-4, rtol=1e-4), \
        f"causal max err {err_c}"

    # Fast path (default): bf16 MXU matmuls with f32 accumulation.
    out_bf16 = jax.block_until_ready(
        multi_head_attention(x, wq, wk, wv, wo_full, bo))
    err_b = jnp.max(jnp.abs(out_bf16 - ref))
    assert jnp.allclose(out_bf16, ref, atol=2e-2, rtol=2e-2), f"bf16 max err {err_b}"

    print("KERNEL_OK")
</pallas_src>

<mosaic_0001>
module attributes {stable_mosaic.version = 11 : i64} {
  func.func @_mha_kernel(%arg0: i32, %arg1: i32, %arg2: i32, %arg3: memref<1x8x32xf32, #tpu.memory_space<vmem>>, %arg4: memref<1x32x64xf32, #tpu.memory_space<vmem>>, %arg5: memref<1x32x192xf32, #tpu.memory_space<vmem>>, %arg6: memref<1x128x32xf32, #tpu.memory_space<vmem>>, %arg7: memref<1x32xf32, #tpu.memory_space<vmem>>, %arg8: memref<1x8x32xf32, #tpu.memory_space<vmem>>, %arg9: memref<8x192xf32, #tpu.memory_space<vmem>>, %arg10: memref<8x32xf32, #tpu.memory_space<vmem>>) attributes {dimension_semantics = [#tpu.dimension_semantics<parallel>, #tpu.dimension_semantics<arbitrary>, #tpu.dimension_semantics<arbitrary>], iteration_bounds = array<i64: 2, 1, 1>, scalar_prefetch = 0 : i64, scratch_operands = 2 : i64, tpu.core_type = #tpu.core_type<tc>, window_params = [{transform_indices = @transform_0, window_bounds = array<i64: 1, 8, 32>}, {pipeline_mode = #tpu.pipeline_mode<synchronous>, transform_indices = @transform_1, window_bounds = array<i64: 1, 32, 64>}, {pipeline_mode = #tpu.pipeline_mode<synchronous>, transform_indices = @transform_2, window_bounds = array<i64: 1, 32, 192>}, {pipeline_mode = #tpu.pipeline_mode<synchronous>, transform_indices = @transform_3, window_bounds = array<i64: 1, 128, 32>}, {pipeline_mode = #tpu.pipeline_mode<synchronous>, transform_indices = @transform_4, window_bounds = array<i64: 1, 32>}, {transform_indices = @transform_5, window_bounds = array<i64: 1, 8, 32>}]} {
    %c0_i32 = arith.constant 0 : i32
    %0 = arith.cmpi eq, %arg2, %c0_i32 : i32
    %1 = arith.extui %0 : i1 to i32
    %c0_i32_0 = arith.constant 0 : i32
    %2 = arith.cmpi ne, %1, %c0_i32_0 : i32
    scf.if %2 {
      %c0_43 = arith.constant 0 : index
      %c0_44 = arith.constant 0 : index
      %c0_45 = arith.constant 0 : index
      %99 = vector.load %arg3[%c0_43, %c0_44, %c0_45] : memref<1x8x32xf32, #tpu.memory_space<vmem>>, vector<1x8x32xf32>
      %100 = vector.shape_cast %99 : vector<1x8x32xf32> to vector<8x32xf32>
      %101 = arith.index_cast %arg1 : i32 to index
      %c0_46 = arith.constant 0 : index
      %c0_47 = arith.constant 0 : index
      %102 = vector.load %arg5[%101, %c0_46, %c0_47] : memref<1x32x192xf32, #tpu.memory_space<vmem>>, vector<1x32x192xf32>
      %103 = vector.shape_cast %102 : vector<1x32x192xf32> to vector<32x192xf32>
      %cst_48 = arith.constant dense<0.000000e+00> : vector<8x192xf32>
      %104 = tpu.matmul %100, %103, %cst_48 {dimension_numbers = #tpu.dot_dimension_numbers<[1], [0], [0], [1], [0, 0, 1, 1], [], []>} : vector<8x32xf32>, vector<32x192xf32>, vector<8x192xf32> -> vector<8x192xf32>
      %c0_49 = arith.constant 0 : index
      %c0_50 = arith.constant 0 : index
      %105 = vector.load %arg9[%c0_49, %c0_50] : memref<8x192xf32, #tpu.memory_space<vmem>>, vector<8x192xf32>
      tpu.vector_store %arg9[%c0_49, %c0_50], %104 {strides = array<i32>} : memref<8x192xf32, #tpu.memory_space<vmem>>, vector<8x192xf32>,
    } else {
    }
    %c8_i32 = arith.constant 8 : i32
    %3 = arith.muli %arg2, %c8_i32 : i32
    %4 = tpu.assume_multiple %3, 8 : i32
    %c0 = arith.constant 0 : index
    %5 = arith.index_cast %4 : i32 to index
    %c0_1 = arith.constant 0 : index
    %6 = vector.load %arg3[%c0, %5, %c0_1] : memref<1x8x32xf32, #tpu.memory_space<vmem>>, vector<1x8x32xf32>
    %7 = vector.shape_cast %6 : vector<1x8x32xf32> to vector<8x32xf32>
    %8 = arith.index_cast %arg1 : i32 to index
    %c0_2 = arith.constant 0 : index
    %c0_3 = arith.constant 0 : index
    %9 = vector.load %arg4[%8, %c0_2, %c0_3] : memref<1x32x64xf32, #tpu.memory_space<vmem>>, vector<1x32x64xf32>
    %10 = vector.shape_cast %9 : vector<1x32x64xf32> to vector<32x64xf32>
    %cst = arith.constant dense<0.000000e+00> : vector<8x64xf32>
    %11 = tpu.matmul %7, %10, %cst {dimension_numbers = #tpu.dot_dimension_numbers<[1], [0], [0], [1], [0, 0, 1, 1], [], []>} : vector<8x32xf32>, vector<32x64xf32>, vector<8x64xf32> -> vector<8x64xf32>
    %cst_4 = arith.constant 2.500000e-01 : f32
    %12 = vector.broadcast %cst_4 : f32 to vector<8x64xf32>
    %13 = arith.mulf %11, %12 : vector<8x64xf32>
    %14 = arith.index_cast %arg1 : i32 to index
    %c0_5 = arith.constant 0 : index
    %c0_6 = arith.constant 0 : index
    %15 = vector.load %arg6[%14, %c0_5, %c0_6] : memref<1x128x32xf32, #tpu.memory_space<vmem>>, vector<1x128x32xf32>
    %16 = vector.shape_cast %15 : vector<1x128x32xf32> to vector<128x32xf32>
    %17 = vector.extract_strided_slice %13 {offsets = [0, 0], sizes = [8, 16], strides = [1, 1]} : vector<8x64xf32> to vector<8x16xf32>
    %c0_7 = arith.constant 0 : index
    %c0_8 = arith.constant 0 : index
    %18 = vector.load %arg9[%c0_7, %c0_8] : memref<8x192xf32, #tpu.memory_space<vmem>>, vector<8x16xf32>
    %c0_9 = arith.constant 0 : index
    %c64 = arith.constant 64 : index
    %19 = vector.load %arg9[%c0_9, %c64] : memref<8x192xf32, #tpu.memory_space<vmem>>, vector<8x32xf32>
    %cst_10 = arith.constant dense<0.000000e+00> : vector<8x8xf32>
    %20 = tpu.matmul %17, %18, %cst_10 {dimension_numbers = #tpu.dot_dimension_numbers<[1], [1], [0], [0], [0, 0, 1, 0], [], []>} : vector<8x16xf32>, vector<8x16xf32>, vector<8x8xf32> -> vector<8x8xf32>
    %cst_11 = arith.constant dense<0xFF800000> : vector<8xf32>
    %21 = vector.multi_reduction <maximumf>, %20, %cst_11 [1] : vector<8x8xf32> to vector<8xf32>
    %22 = vector.shape_cast %21 : vector<8xf32> to vector<8x1xf32>
    %23 = vector.broadcast %22 : vector<8x1xf32> to vector<8x8xf32>
    %24 = arith.subf %20, %23 : vector<8x8xf32>
    %25 = math.exp %24 : vector<8x8xf32>
    %cst_12 = arith.constant dense<0.000000e+00> : vector<8xf32>
    %26 = vector.multi_reduction <add>, %25, %cst_12 [1] : vector<8x8xf32> to vector<8xf32>
    %27 = vector.shape_cast %26 : vector<8xf32> to vector<8x1xf32>
    %28 = tpu.reciprocal %27 : vector<8x1xf32> -> vector<8x1xf32>
    %cst_13 = arith.constant dense<0.000000e+00> : vector<8x32xf32>
    %29 = tpu.matmul %25, %19, %cst_13 {dimension_numbers = #tpu.dot_dimension_numbers<[1], [0], [0], [1], [0, 0, 1, 1], [], []>} : vector<8x8xf32>, vector<8x32xf32>, vector<8x32xf32> -> vector<8x32xf32>
    %30 = vector.broadcast %28 : vector<8x1xf32> to vector<8x32xf32>
    %31 = arith.mulf %29, %30 : vector<8x32xf32>
    %32 = vector.extract_strided_slice %16 {offsets = [0, 0], sizes = [32, 32], strides = [1, 1]} : vector<128x32xf32> to vector<32x32xf32>
    %cst_14 = arith.constant dense<0.000000e+00> : vector<8x32xf32>
    %33 = tpu.matmul %31, %32, %cst_14 {dimension_numbers = #tpu.dot_dimension_numbers<[1], [0], [0], [1], [0, 0, 1, 1], [], []>} : vector<8x32xf32>, vector<32x32xf32>, vector<8x32xf32> -> vector<8x32xf32>
    %34 = vector.extract_strided_slice %13 {offsets = [0, 16], sizes = [8, 16], strides = [1, 1]} : vector<8x64xf32> to vector<8x16xf32>
    %c0_15 = arith.constant 0 : index
    %c16 = arith.constant 16 : index
    %35 = vector.load %arg9[%c0_15, %c16] : memref<8x192xf32, #tpu.memory_space<vmem>>, vector<8x16xf32>
    %c0_16 = arith.constant 0 : index
    %c96 = arith.constant 96 : index
    %36 = vector.load %arg9[%c0_16, %c96] : memref<8x192xf32, #tpu.memory_space<vmem>>, vector<8x32xf32>
    %cst_17 = arith.constant dense<0.000000e+00> : vector<8x8xf32>
    %37 = tpu.matmul %34, %35, %cst_17 {dimension_numbers = #tpu.dot_dimension_numbers<[1], [1], [0], [0], [0, 0, 1, 0], [], []>} : vector<8x16xf32>, vector<8x16xf32>, vector<8x8xf32> -> vector<8x8xf32>
    %cst_18 = arith.constant dense<0xFF800000> : vector<8xf32>
    %38 = vector.multi_reduction <maximumf>, %37, %cst_18 [1] : vector<8x8xf32> to vector<8xf32>
    %39 = vector.shape_cast %38 : vector<8xf32> to vector<8x1xf32>
    %40 = vector.broadcast %39 : vector<8x1xf32> to vector<8x8xf32>
    %41 = arith.subf %37, %40 : vector<8x8xf32>
    %42 = math.exp %41 : vector<8x8xf32>
    %cst_19 = arith.constant dense<0.000000e+00> : vector<8xf32>
    %43 = vector.multi_reduction <add>, %42, %cst_19 [1] : vector<8x8xf32> to vector<8xf32>
    %44 = vector.shape_cast %43 : vector<8xf32> to vector<8x1xf32>
    %45 = tpu.reciprocal %44 : vector<8x1xf32> -> vector<8x1xf32>
    %cst_20 = arith.constant dense<0.000000e+00> : vector<8x32xf32>
    %46 = tpu.matmul %42, %36, %cst_20 {dimension_numbers = #tpu.dot_dimension_numbers<[1], [0], [0], [1], [0, 0, 1, 1], [], []>} : vector<8x8xf32>, vector<8x32xf32>, vector<8x32xf32> -> vector<8x32xf32>
    %47 = vector.broadcast %45 : vector<8x1xf32> to vector<8x32xf32>
    %48 = arith.mulf %46, %47 : vector<8x32xf32>
    %49 = vector.extract_strided_slice %16 {offsets = [32, 0], sizes = [32, 32], strides = [1, 1]} : vector<128x32xf32> to vector<32x32xf32>
    %cst_21 = arith.constant dense<0.000000e+00> : vector<8x32xf32>
    %50 = tpu.matmul %48, %49, %cst_21 {dimension_numbers = #tpu.dot_dimension_numbers<[1], [0], [0], [1], [0, 0, 1, 1], [], []>} : vector<8x32xf32>, vector<32x32xf32>, vector<8x32xf32> -> vector<8x32xf32>
    %51 = arith.addf %33, %50 : vector<8x32xf32>
    %52 = vector.extract_strided_slice %13 {offsets = [0, 32], sizes = [8, 16], strides = [1, 1]} : vector<8x64xf32> to vector<8x16xf32>
    %c0_22 = arith.constant 0 : index
    %c32 = arith.constant 32 : index
    %53 = vector.load %arg9[%c0_22, %c32] : memref<8x192xf32, #tpu.memory_space<vmem>>, vector<8x16xf32>
    %c0_23 = arith.constant 0 : index
    %c128 = arith.constant 128 : index
    %54 = vector.load %arg9[%c0_23, %c128] : memref<8x192xf32, #tpu.memory_space<vmem>>, vector<8x32xf32>
    %cst_24 = arith.constant dense<0.000000e+00> : vector<8x8xf32>
    %55 = tpu.matmul %52, %53, %cst_24 {dimension_numbers = #tpu.dot_dimension_numbers<[1], [1], [0], [0], [0, 0, 1, 0], [], []>} : vector<8x16xf32>, vector<8x16xf32>, vector<8x8xf32> -> vector<8x8xf32>
    %cst_25 = arith.constant dense<0xFF800000> : vector<8xf32>
    %56 = vector.multi_reduction <maximumf>, %55, %cst_25 [1] : vector<8x8xf32> to vector<8xf32>
    %57 = vector.shape_cast %56 : vector<8xf32> to vector<8x1xf32>
    %58 = vector.broadcast %57 : vector<8x1xf32> to vector<8x8xf32>
    %59 = arith.subf %55, %58 : vector<8x8xf32>
    %60 = math.exp %59 : vector<8x8xf32>
    %cst_26 = arith.constant dense<0.000000e+00> : vector<8xf32>
    %61 = vector.multi_reduction <add>, %60, %cst_26 [1] : vector<8x8xf32> to vector<8xf32>
    %62 = vector.shape_cast %61 : vector<8xf32> to vector<8x1xf32>
    %63 = tpu.reciprocal %62 : vector<8x1xf32> -> vector<8x1xf32>
    %cst_27 = arith.constant dense<0.000000e+00> : vector<8x32xf32>
    %64 = tpu.matmul %60, %54, %cst_27 {dimension_numbers = #tpu.dot_dimension_numbers<[1], [0], [0], [1], [0, 0, 1, 1], [], []>} : vector<8x8xf32>, vector<8x32xf32>, vector<8x32xf32> -> vector<8x32xf32>
    %65 = vector.broadcast %63 : vector<8x1xf32> to vector<8x32xf32>
    %66 = arith.mulf %64, %65 : vector<8x32xf32>
    %67 = vector.extract_strided_slice %16 {offsets = [64, 0], sizes = [32, 32], strides = [1, 1]} : vector<128x32xf32> to vector<32x32xf32>
    %cst_28 = arith.constant dense<0.000000e+00> : vector<8x32xf32>
    %68 = tpu.matmul %66, %67, %cst_28 {dimension_numbers = #tpu.dot_dimension_numbers<[1], [0], [0], [1], [0, 0, 1, 1], [], []>} : vector<8x32xf32>, vector<32x32xf32>, vector<8x32xf32> -> vector<8x32xf32>
    %69 = arith.addf %51, %68 : vector<8x32xf32>
    %70 = vector.extract_strided_slice %13 {offsets = [0, 48], sizes = [8, 16], strides = [1, 1]} : vector<8x64xf32> to vector<8x16xf32>
    %c0_29 = arith.constant 0 : index
    %c48 = arith.constant 48 : index
    %71 = vector.load %arg9[%c0_29, %c48] : memref<8x192xf32, #tpu.memory_space<vmem>>, vector<8x16xf32>
    %c0_30 = arith.constant 0 : index
    %c160 = arith.constant 160 : index
    %72 = vector.load %arg9[%c0_30, %c160] : memref<8x192xf32, #tpu.memory_space<vmem>>, vector<8x32xf32>
    %cst_31 = arith.constant dense<0.000000e+00> : vector<8x8xf32>
    %73 = tpu.matmul %70, %71, %cst_31 {dimension_numbers = #tpu.dot_dimension_numbers<[1], [1], [0], [0], [0, 0, 1, 0], [], []>} : vector<8x16xf32>, vector<8x16xf32>, vector<8x8xf32> -> vector<8x8xf32>
    %cst_32 = arith.constant dense<0xFF800000> : vector<8xf32>
    %74 = vector.multi_reduction <maximumf>, %73, %cst_32 [1] : vector<8x8xf32> to vector<8xf32>
    %75 = vector.shape_cast %74 : vector<8xf32> to vector<8x1xf32>
    %76 = vector.broadcast %75 : vector<8x1xf32> to vector<8x8xf32>
    %77 = arith.subf %73, %76 : vector<8x8xf32>
    %78 = math.exp %77 : vector<8x8xf32>
    %cst_33 = arith.constant dense<0.000000e+00> : vector<8xf32>
    %79 = vector.multi_reduction <add>, %78, %cst_33 [1] : vector<8x8xf32> to vector<8xf32>
    %80 = vector.shape_cast %79 : vector<8xf32> to vector<8x1xf32>
    %81 = tpu.reciprocal %80 : vector<8x1xf32> -> vector<8x1xf32>
    %cst_34 = arith.constant dense<0.000000e+00> : vector<8x32xf32>
    %82 = tpu.matmul %78, %72, %cst_34 {dimension_numbers = #tpu.dot_dimension_numbers<[1], [0], [0], [1], [0, 0, 1, 1], [], []>} : vector<8x8xf32>, vector<8x32xf32>, vector<8x32xf32> -> vector<8x32xf32>
    %83 = vector.broadcast %81 : vector<8x1xf32> to vector<8x32xf32>
    %84 = arith.mulf %82, %83 : vector<8x32xf32>
    %85 = vector.extract_strided_slice %16 {offsets = [96, 0], sizes = [32, 32], strides = [1, 1]} : vector<128x32xf32> to vector<32x32xf32>
    %cst_35 = arith.constant dense<0.000000e+00> : vector<8x32xf32>
    %86 = tpu.matmul %84, %85, %cst_35 {dimension_numbers = #tpu.dot_dimension_numbers<[1], [0], [0], [1], [0, 0, 1, 1], [], []>} : vector<8x32xf32>, vector<32x32xf32>, vector<8x32xf32> -> vector<8x32xf32>
    %87 = arith.addf %69, %86 : vector<8x32xf32>
    %c0_i32_36 = arith.constant 0 : i32
    %88 = arith.cmpi eq, %arg1, %c0_i32_36 : i32
    %89 = arith.extui %88 : i1 to i32
    %c0_i32_37 = arith.constant 0 : i32
    %90 = arith.cmpi ne, %89, %c0_i32_37 : i32
    scf.if %90 {
      %99 = arith.index_cast %4 : i32 to index
      %c0_43 = arith.constant 0 : index
      %100 = vector.load %arg10[%99, %c0_43] : memref<8x32xf32, #tpu.memory_space<vmem>>, vector<8x32xf32>
      tpu.vector_store %arg10[%99, %c0_43], %87 {strides = array<i32>} : memref<8x32xf32, #tpu.memory_space<vmem>>, vector<8x32xf32>,
    } else {
    }
    %c0_i32_38 = arith.constant 0 : i32
    %91 = arith.cmpi sgt, %arg1, %c0_i32_38 : i32
    %92 = arith.extui %91 : i1 to i32
    %c0_i32_39 = arith.constant 0 : i32
    %93 = arith.cmpi ne, %92, %c0_i32_39 : i32
    scf.if %93 {
      %99 = arith.index_cast %4 : i32 to index
      %c0_43 = arith.constant 0 : index
      %100 = vector.load %arg10[%99, %c0_43] : memref<8x32xf32, #tpu.memory_space<vmem>>, vector<8x32xf32>
      %101 = arith.addf %100, %87 : vector<8x32xf32>
      %102 = arith.index_cast %4 : i32 to index
      %c0_44 = arith.constant 0 : index
      %103 = vector.load %arg10[%102, %c0_44] : memref<8x32xf32, #tpu.memory_space<vmem>>, vector<8x32xf32>
      tpu.vector_store %arg10[%102, %c0_44], %101 {strides = array<i32>} : memref<8x32xf32, #tpu.memory_space<vmem>>, vector<8x32xf32>,
    } else {
    }
    %c0_i32_40 = arith.constant 0 : i32
    %94 = arith.cmpi eq, %arg1, %c0_i32_40 : i32
    %c0_i32_41 = arith.constant 0 : i32
    %95 = arith.cmpi eq, %arg2, %c0_i32_41 : i32
    %96 = arith.andi %94, %95 : i1
    %97 = arith.extui %96 : i1 to i32
    %c0_i32_42 = arith.constant 0 : i32
    %98 = arith.cmpi ne, %97, %c0_i32_42 : i32
    scf.if %98 {
      %c0_43 = arith.constant 0 : index
      %c0_44 = arith.constant 0 : index
      %99 = vector.load %arg10[%c0_43, %c0_44] : memref<8x32xf32, #tpu.memory_space<vmem>>, vector<8x32xf32>
      %c0_45 = arith.constant 0 : index
      %c0_46 = arith.constant 0 : index
      %100 = vector.load %arg7[%c0_45, %c0_46] : memref<1x32xf32, #tpu.memory_space<vmem>>, vector<1x32xf32>
      %101 = vector.broadcast %100 : vector<1x32xf32> to vector<8x32xf32>
      %102 = arith.addf %99, %101 : vector<8x32xf32>
      %c0_47 = arith.constant 0 : index
      %c0_48 = arith.constant 0 : index
      %c0_49 = arith.constant 0 : index
      %103 = vector.load %arg8[%c0_47, %c0_48, %c0_49] : memref<1x8x32xf32, #tpu.memory_space<vmem>>, vector<1x8x32xf32>
      %104 = vector.shape_cast %103 : vector<1x8x32xf32> to vector<8x32xf32>
      %105 = vector.shape_cast %102 : vector<8x32xf32> to vector<1x8x32xf32>
      tpu.vector_store %arg8[%c0_47, %c0_48, %c0_49], %105 {strides = array<i32>} : memref<1x8x32xf32, #tpu.memory_space<vmem>>, vector<1x8x32xf32>,
    } else {
    }
    return
  }
  func.func @transform_0(%arg0: i32, %arg1: i32, %arg2: i32) -> (i32, i32, i32) {
    %c0_i32 = arith.constant 0 : i32
    %c0_i32_0 = arith.constant 0 : i32
    %c0_i32_1 = arith.constant 0 : i32
    return %arg0, %c0_i32, %c0_i32_0 : i32, i32, i32
  }
  func.func @transform_1(%arg0: i32, %arg1: i32, %arg2: i32) -> (i32, i32, i32) {
    %c0_i32 = arith.constant 0 : i32
    %c0_i32_0 = arith.constant 0 : i32
    %c0_i32_1 = arith.constant 0 : i32
    %c0_i32_2 = arith.constant 0 : i32
    return %c0_i32, %c0_i32_0, %c0_i32_1 : i32, i32, i32
  }
  func.func @transform_2(%arg0: i32, %arg1: i32, %arg2: i32) -> (i32, i32, i32) {
    %c0_i32 = arith.constant 0 : i32
    %c0_i32_0 = arith.constant 0 : i32
    %c0_i32_1 = arith.constant 0 : i32
    %c0_i32_2 = arith.constant 0 : i32
    return %c0_i32, %c0_i32_0, %c0_i32_1 : i32, i32, i32
  }
  func.func @transform_3(%arg0: i32, %arg1: i32, %arg2: i32) -> (i32, i32, i32) {
    %c0_i32 = arith.constant 0 : i32
    %c0_i32_0 = arith.constant 0 : i32
    %c0_i32_1 = arith.constant 0 : i32
    %c0_i32_2 = arith.constant 0 : i32
    return %c0_i32, %c0_i32_0, %c0_i32_1 : i32, i32, i32
  }
  func.func @transform_4(%arg0: i32, %arg1: i32, %arg2: i32) -> (i32, i32) {
    %c0_i32 = arith.constant 0 : i32
    %c0_i32_0 = arith.constant 0 : i32
    %c0_i32_1 = arith.constant 0 : i32
    return %c0_i32, %c0_i32_0 : i32, i32
  }
  func.func @transform_5(%arg0: i32, %arg1: i32, %arg2: i32) -> (i32, i32, i32) {
    %c0_i32 = arith.constant 0 : i32
    %c0_i32_0 = arith.constant 0 : i32
    %c0_i32_1 = arith.constant 0 : i32
    return %arg0, %c0_i32, %c0_i32_0 : i32, i32, i32
  }
}

</mosaic_0001>

<bundles_post_ra>
// kernel: tpu_custom_call.1
= control target key start
LH: loop header
LB: loop body
LE: loop exit
PB: predicated region body
PF: predicated region fallthrough
CT: control target
= control target key end

     0   :  { %10 = vsyncpa [#allocation5], 0  ;;  %s2202_s0 = inlined_call_operand.vmem [shape: f32[2,8,32], index: 0, kind: input, shape index: {}]   ;;  %s2203_s1 = inlined_call_operand.vmem [shape: f32[1,32,64], index: 1, kind: input, shape index: {}]   ;;  %s2204_s2 = inlined_call_operand.vmem [shape: f32[1,32,192], index: 2, kind: input, shape index: {}]   ;;  %s2205_s3 = inlined_call_operand.vmem [shape: f32[1,128,32], index: 3, kind: input, shape index: {}]   ;;  %s2206_s4 = inlined_call_operand.vmem [shape: f32[1,32], index: 4, kind: input, shape index: {}]   ;;  %s2207_s5 = inlined_call_operand.hbm [shape: f32[2,8,32], index: 5, kind: output, shape index: {}]  }
   0x1   :  { %12 = vsyncpa [#allocation5 + $0x1], 0  ;;  %s1921_s18 = smov 0   ;;  %s1923_s19 = smov 0  }
   0x2   :  { %s1925_s20 = smov 0   ;;  %s1927_s21 = smov 0  }
   0x3   :  { %s1929_s22 = smov 0   ;;  %s1931_s23 = smov 0  }
   0x4 LB: > { %s1513_s24 = sadd.s32 4294967295, %s1880_s23   ;;  %s1514_s25 = sadd.s32 4294967294, %s1880_s23   ;;  %s1880_s23 = sphi %s1931_s23, %s18_s23   ;;  %s1876_s22 = sphi %s1929_s22, %s2214_s22   ;;  %s1872_s21 = sphi %s1927_s21, %s2213_s21   ;;  %s1868_s20 = sphi %s1925_s20, %s2212_s20   ;;  %s1864_s19 = sphi %s1923_s19, %s2211_s19   ;;  %s1860_s18 = sphi %s1921_s18, %s2210_s18  }
   0x5   : > { %s37_s26 = sadd.s32 1, %s1876_s22  ;;  %s154_s27 = sadd.s32 1, %s1868_s20 }
   0x6   : > { %p39_p0 = scmp.ge.s32.totalorder %s37_s26, 2  ;;  %p164_p1 = scmp.ne.s32.totalorder %s1868_s20, %s1864_s19 }
   0x7   : > { %p165_p2 = scmp.eq.s32.totalorder %s1513_s24, 1  ;;  %p170_p3 = scmp.ne.s32.totalorder %s1864_s19, %s1860_s18 }
   0x8   : > { %s2216_s26 = smov (%p39_p0, %s37_s26), 0  ;;  %p171_p5 = scmp.eq.s32.totalorder %s1514_s25, 1 }
   0x9   : > { %p1961_p4 = por %p165_p2, %p164_p1  ;;  %s151_s29 = ssub.s32 %s1876_s22, %s2216_s26 }
   0xa   : > { %p1517_p6 = scmp.ge.s32.totalorder %s1880_s23, 1  ;;  %p152_p7 = scmp.eq.s32.totalorder %s151_s29, 0 }
   0xb   : > { %p1968_p8 = por %p171_p5, %p170_p3  ;;  %p208_p9 = scmp.lt.s32.totalorder %s1880_s23, 3 }
   0xc   : > { %s1974_s6 = scalar_select %p152_p7, %s1868_s20, %s154_s27  }
   0xd   : > { %p209_p10 = pnand %p1517_p6, %p208_p9 }
   0xe   : > { %v248_v0 = vld [vmem:[%s2204_s2 + $0x8] sm:$0xff] (!%p209_p10)  ;;  %v250_v1 = vld [vmem:[%s2204_s2 + $0x18] sm:$0xff] (!%p209_p10)  ;;  %v247_v2 = vld [vmem:[%s2204_s2] sm:$0xff] (!%p209_p10)  ;;  %p235_p11 = scmp.lt.s32.totalorder (!%p209_p10), %s1872_s21, 1  ;;  %v1882_v7 = vmov (!%p209_p10), 0.0   ;;  %vm1883_vm0 = vmmov (!%p209_p10), 0  }
   0xf   : > { %212 = sbr.rel (%p209_p10) target bundleno = 1932 (0x78c), region = 40  ;;  %v1679_v3 = vpack.c.bf16 (!%p209_p10), %v250_v1, %v248_v0  ;;  %v249_v4 = vld [vmem:[%s2204_s2 + $0x10] sm:$0xff] (!%p209_p10)  ;;  %v252_v5 = vld [vmem:[%s2204_s2 + $0x28] sm:$0xff] (!%p209_p10)  ;;  %v254_v6 = vld [vmem:[%s2204_s2 + $0x38] sm:$0xff] (!%p209_p10)  ;;  %323 = vmatprep.mubr.f32.mxu1 (!%p209_p10), %v1882_v7  ;;  %1595 = vmatprep.subr.mxu0 (!%p209_p10), %v1882_v7  ;;  %vm255_vm1 = vcmask (!%p209_p10), 261120   ;;  %v1884_v17 = vmov (!%p209_p10), 0.0|0.0  }
  0x10   : > { %v1681_v8 = vpack.c.bf16 (!%p209_p10), %v249_v4, %v247_v2  ;;  %v1683_v9 = vpack.c.bf16 (!%p209_p10), %v254_v6, %v252_v5  ;;  %v251_v10 = vld [vmem:[%s2204_s2 + $0x20] sm:$0xff] (!%p209_p10)  ;;  %v253_v11 = vld [vmem:[%s2204_s2 + $0x30] sm:$0xff] (!%p209_p10)  ;;  %1597 = vmatprep.mubr.msk.f32.mxu0 (!%p209_p10), %vm1883_vm0, %v1882_v7  ;;  %v339_v14 = vld [vmem:[%s2203_s1 + $0x8] sm:$0xff] (!%p209_p10)  ;;  %vm436_vm2 = vcmask (!%p209_p10), 130048   ;;  %vm331_vm3 = vcmask (!%p209_p10), 523264   ;;  %s1885_s29 = smov (!%p209_p10), 112  }
  0x11   : > { %1680 = vmatprep.subr.bf16.mxu1 (!%p209_p10), %v1679_v3  ;;  %v1685_v12 = vpack.c.bf16 (!%p209_p10), %v253_v11, %v251_v10  ;;  %v338_v13 = vld [vmem:[%s2203_s1] sm:$0xff] (!%p209_p10)  ;;  %v340_v18 = vld [vmem:[%s2203_s1 + $0x10] sm:$0xff] (!%p209_p10)  ;;  %v341_v19 = vld [vmem:[%s2203_s1 + $0x18] sm:$0xff] (!%p209_p10)  ;;  %s1886_s7 = smov (!%p209_p10), 64   ;;  %vm513_vm4 = vcmask (!%p209_p10), 64512   ;;  %s1889_s10 = smov (!%p209_p10), 80  }
  0x12   : > { %1682 = vmatpush1.bf16.msra.mxu1 (!%p209_p10), %v1681_v8  ;;  %v1688_v16 = vpack.c.bf16 (!%p209_p10), %v339_v14, %v338_v13  ;;  %v1691_v20 = vpack.c.bf16 (!%p209_p10), %v341_v19, %v340_v18  ;;  %v423_v5 = vld [vmem:[%s2205_s3 + $0x20] sm:$0xff] (!%p209_p10)  ;;  %v424_v6 = vld [vmem:[%s2205_s3 + $0x28] sm:$0xff] (!%p209_p10)  ;;  %v426_v10 = vld [vmem:[%s2205_s3 + $0x38] sm:$0xff] (!%p209_p10)  ;;  %s232_s13 = sand.u32 (!%p209_p10), 1, %s1864_s19   ;;  %s1540_s17 = sshll.u32 (!%p209_p10), %s1872_s21, 7 }
  0x13   : > { %1684 = vmatprep.subr.bf16.mxu1 (!%p209_p10), %v1683_v9  ;;  %v1694_v8 = vpack.c.bf16 (!%p209_p10), %v424_v6, %v423_v5  ;;  %v425_v9 = vld [vmem:[%s2205_s3 + $0x30] sm:$0xff] (!%p209_p10)  ;;  %v419_v18 = vld [vmem:[%s2205_s3] sm:$0xff] (!%p209_p10)  ;;  %v420_v19 = vld [vmem:[%s2205_s3 + $0x8] sm:$0xff] (!%p209_p10)  ;;  %s1518_s14 = sshll.u32 (!%p209_p10), %s232_s13, 3 }
  0x14   : > { %v1697_v11 = vpack.c.bf16 (!%p209_p10), %v426_v10, %v425_v9  ;;  %s234_s24 = scalar_lea.vmem (!%p209_p10), [#allocation4], %s1518_s14 }
  0x15   : > { %s1431_s25 = sshll.u32 (!%p209_p10), %s234_s24, 4  ;;  %s2156_s25 = int_to_ptr.vmem [resolvable:$true] %s1431_s25 }
  0x16   : > { %s236_s8 = scalar_select %p235_p11, %s1872_s21, 1  ;;  %1686 = vmatpush1.bf16.msra.mxu1 %v1685_v12 }
  0x17   : > { %1687 = vmatprep.subr.bf16.mxu1 %v1884_v17  ;;  %s1890_s21 = smov [#allocation4]  }
  0x18   : > { %s1519_s9 = sshll.u32 %s236_s8, 3  ;;  %s1887_s8 = smov 96  }
  0x19   : > { %s238_s12 = scalar_lea.vmem %s2202_s0, %s1519_s9  ;;  %s1888_s9 = smov 32  }
  0x1a   : > { %v243_v15 = vld [vmem:[%s238_s12] sm:$0xff] }
  0x1b   : > { %1520 = vmatmul.mubr.msk.f32.vlgmr.msra.gmra.mrb[0].mxu1 %vm255_vm1, %v243_v15 }
  0x1c   : > { %1689 = vmatpush3.bf16.msra.mxu1 %v1688_v16  ;;  %1592 = vmatprep.mubr.msk.f32.mxu1 %vm1883_vm0, %v1882_v7 }
  0x1d   : > { %1690 = vmatprep.subr.bf16.mxu1 %v1884_v17 }
  0x20   : > { %1692 = vmatpush3.bf16.msra.mxu1 %v1691_v20 }
  0x21   : > { %1600 = vmatprep.subr.mxu1 %v1882_v7 }
  0x23   : > { %1593 = vmatmul.mubr.msk.f32.vlgmr.msra.gmra.mrb[2].mxu1 %vm255_vm1, %v243_v15 }
  0x24   : > { %1602 = vmatprep.mubr.msk.f32.mxu1 %vm1883_vm0, %v1882_v7 }
  0xee   : > { %v325_v21 = vpop.f32.mrb[0].mxu1 }
  0xef   : > { %v327_v22 = vpop.f32.mrb[1].mxu1  ;;  %603 = vrot.lane.b32.xlu0 %v325_v21, %s1885_s29  ;;  %1596 = vmatpush3.xpose.msk.msra.mxu0 %vm436_vm2, %v325_v21 }
  0xf0   : > { %332 = vst.msk [vmem:[#allocation2 + $0x8] sm:$0xff] %vm331_vm3, %v327_v22  ;;  %1605 = vmatprep.subr.mxu0 %v1882_v7 }
  0xf6   : > { %v412_v23 = vpop.f32.mrb[2].mxu1 }
  0xf7   : > { %v416_v24 = vmul.f32 0.25, %v412_v23  ;;  %v1594_v25 = vpop.f32.mrb[3].mxu1  ;;  %v912_v46 = vld [vmem:[#allocation2 + $0x8] sm:$0xff]  ;;  %v1700_v23 = vpack.c.bf16 %v420_v19, %v419_v18 }
  0xf9   : > { %1598 = vmatmul.mubr.msk.f32.vlgmr.msra.gmra.mrb[0].mxu0 %vm436_vm2, %v416_v24  ;;  %601 = vrot.lane.b32.xlu0 %v416_v24, %s1885_s29 }
  0xfa   : > { %1607 = vmatprep.mubr.msk.f32.mxu0 %vm1883_vm0, %v1882_v7 }
  0xfd   : > { %524 = vrot.lane.b32.xlu0 %v325_v21, %s1886_s7  ;;  %s2154_s7 = scalar_lea.hbm %s2207_s5, %s1540_s17 }
 0x101   : > { %915 = vrot.lane.b32.xlu0 %v325_v21, %s1887_s8 }
 0x105   : > { %913 = vrot.lane.b32.xlu0 %v416_v24, %s1887_s8 }
 0x161   : > { %v604_v26 = vpop.permute.xlu0 %603 }
 0x162   : > { %1606 = vmatpush3.xpose.msk.msra.mxu0 %vm436_vm2, %v604_v26  ;;  %v421_v26 = vld [vmem:[%s2205_s3 + $0x10] sm:$0xff] }
 0x163   : > { %1693 = vmatprep.subr.bf16.mxu0 %v1884_v17 }
 0x16b   : > { %v602_v27 = vpop.permute.xlu0 %601 }
 0x16c   : > { %1608 = vmatmul.mubr.msk.f32.vlgmr.msra.gmra.mrb[2].mxu0 %vm436_vm2, %v602_v27  ;;  %v422_v27 = vld [vmem:[%s2205_s3 + $0x18] sm:$0xff] }
 0x16d   : > { %1623 = vmatprep.mubr.msk.f32.mxu0 %vm1883_vm0, %v1882_v7  ;;  %1695 = vmatpush3.bf16.msra.mxu0 %v1694_v8 }
 0x16e   : > { %1696 = vmatprep.subr.bf16.mxu0 %v1884_v17 }
 0x16f   : > { %v525_v28 = vpop.permute.xlu0 %524 }
 0x170   : > { %1601 = vmatpush3.msra.mxu1 %v525_v28  ;;  %v1703_v28 = vpack.c.bf16 %v422_v27, %v421_v26 }
 0x171   : > { %1610 = vmatprep.subr.mxu1 %v1882_v7  ;;  %1698 = vmatpush3.bf16.msra.mxu0 %v1697_v11 }
 0x172   : > { %1699 = vmatprep.subr.bf16.mxu0 %v1884_v17 }
 0x173   : > { %v916_v43 = vpop.permute.xlu0 %915 }
 0x177   : > { %v914_v45 = vpop.permute.xlu0 %913 }
 0x1cc   : > { %v509_v29 = vpop.f32.mrb[0].mxu0 }
 0x1cd   : > { %v1599_v30 = vpop.f32.mrb[1].mxu0  ;;  %v514_v31 = vsel %vm513_vm4, %v509_v29, -inf }
 0x1ce   : > { %515 = vmax.xlane.f32.xlu1 %v514_v31  ;;  %v428_v30 = vld [vmem:[%s2205_s3 + $0x48] sm:$0xff] }
 0x23f   : > { %v675_v32 = vpop.f32.mrb[2].mxu0 }
 0x240   : > { %v1609_v33 = vpop.f32.mrb[3].mxu0  ;;  %v679_v34 = vsel %vm513_vm4, %v675_v32, -inf }
 0x241   : > { %680 = vmax.xlane.f32.xlu1 %v679_v34  ;;  %v429_v34 = vld [vmem:[%s2205_s3 + $0x50] sm:$0xff] }
 0x252   : > { %689 = vrot.lane.b32.xlu1 %v325_v21, %s1888_s9  ;;  %s1802_s9 = scalar_lea.vmem %s2156_s25, 128 }
 0x253   : > { %p1803_p12 = scmp.ne.s32.totalorder %s2156_s25, %s1802_s9 }
 0x255   : > { %p1804_p13 = pnand %p1803_p12, %p1961_p4 }
 0x256   : > { %1151 = vrot.lane.b32.xlu1 %v325_v21, %s1889_s10 }
 0x257   : > { %p1805_p0 = pneg %p1804_p13 }
 0x25a   : > { %1149 = vrot.lane.b32.xlu1 %v416_v24, %s1889_s10  ;;  %s1806_s10 = sshll.u32 %s1890_s21, 4  ;;  %s1807_s10 = int_to_ptr.vmem [resolvable:$false] %s1806_s10 }
 0x25b   : > { %v516_v35 = vpop.xlane.xlu1 %515  ;;  %s1808_s11 = scalar_lea.vmem %s1807_s10, 256  ;;  %p1809_p1 = scmp.lt.s32.totalorder %s2156_s25, %s1807_s10 }
 0x25c   : > { %v517_v36 = vsub.f32 %v509_v29, %v516_v35  ;;  %v427_v29 = vld [vmem:[%s2205_s3 + $0x40] sm:$0xff]  ;;  %v430_v35 = vld [vmem:[%s2205_s3 + $0x58] sm:$0xff]  ;;  %p1810_p2 = scmp.lt.s32.totalorder %s1808_s11, %s1802_s9 }
 0x25e   : > { %v518_v37 = vmul.f32 1.442695, %v517_v36  ;;  %v1709_v36 = vpack.c.bf16 %v430_v35, %v429_v34  ;;  %p1811_p3 = por %p1810_p2, %p1809_p1 }
 0x260   : > { %1786 = vpow2.f32 %v518_v37  ;;  %p1812_p5 = pnand %p1811_p3, %p1805_p0 }
 0x26a   : > { %v1787_v38 = vpop.eup %1786 }
 0x26b   : > { %1603 = vmatmul.mubr.msk.f32.vlgmr.msra.gmra.mrb[4].mxu1 %vm513_vm4, %v1787_v38  ;;  %v520_v54 = vsel %vm513_vm4, %v1787_v38, 0.0  ;;  %v431_v38 = vld [vmem:[%s2205_s3 + $0x60] sm:$0xff] }
 0x26c   : > { %1612 = vmatprep.mubr.msk.f32.mxu1 %vm1883_vm0, %v1882_v7 }
 0x2ce   : > { %v681_v39 = vpop.xlane.xlu1 %680 }
 0x2cf   : > { %v682_v40 = vsub.f32 %v675_v32, %v681_v39  ;;  %v1706_v32 = vpack.c.bf16 %v428_v30, %v427_v29  ;;  %v432_v39 = vld [vmem:[%s2205_s3 + $0x68] sm:$0xff] }
 0x2d1   : > { %v683_v41 = vmul.f32 1.442695, %v682_v40  ;;  %v1712_v40 = vpack.c.bf16 %v432_v39, %v431_v38 }
 0x2d2   : > { %v690_v42 = vpop.permute.xlu1 %689 }
 0x2d3   : > { %1788 = vpow2.f32 %v683_v41  ;;  %1611 = vmatpush3.msra.mxu1 %v690_v42  ;;  %v433_v42 = vld [vmem:[%s2205_s3 + $0x70] sm:$0xff] }
 0x2d4   : > { %1637 = vmatprep.subr.mxu1 %v1882_v7 }
 0x2d6   : > { %v1152_v58 = vpop.permute.xlu1 %1151 }
 0x2da   : > { %v1150_v60 = vpop.permute.xlu1 %1149 }
 0x2dd   : > { %v1789_v44 = vpop.eup %1788 }
 0x2de   : > { %1613 = vmatmul.mubr.msk.f32.vlgmr.msra.gmra.mrb[6].mxu1 %vm513_vm4, %v1789_v44  ;;  %v685_v3 = vsel %vm513_vm4, %v1789_v44, 0.0 }
 0x2df   : > { %1638 = vmatpush3.xpose.msk.msra.mxu1 %vm436_vm2, %v916_v43  ;;  %1639 = vmatprep.mubr.msk.f32.mxu1 %vm1883_vm0, %v1882_v7  ;;  %v434_v43 = vld [vmem:[%s2205_s3 + $0x78] sm:$0xff] }
 0x2e0   : > { %1642 = vmatprep.subr.mxu1 %v1882_v7  ;;  %v1715_v44 = vpack.c.bf16 %v434_v43, %v433_v42 }
 0x2e2   : > { %1640 = vmatmul.mubr.msk.f32.vlgmr.msra.gmra.mrb[8].mxu1 %vm436_vm2, %v914_v45 }
 0x2e3   : > { %1643 = vmatpush3.msra.mxu1 %v912_v46  ;;  %1644 = vmatprep.mubr.msk.f32.mxu1 %vm1883_vm0, %v1882_v7 }
 0x2e4   : > { %1658 = vmatprep.subr.mxu1 %v1882_v7 }
 0x33e   : > { %v2058_v47 = vpop.f32.mrb[4].mxu1 }
 0x33f   : > { %v1604_v48 = vpop.f32.mrb[5].mxu1 }
 0x3b1   : > { %v761_v49 = vpop.f32.mrb[6].mxu1 }
 0x3b2   : > { %v1614_v50 = vpop.f32.mrb[7].mxu1 }
 0x3b5   : > { %v987_v51 = vpop.f32.mrb[8].mxu1 }
 0x3b6   : > { %v1641_v52 = vpop.f32.mrb[9].mxu1  ;;  %v991_v53 = vsel %vm513_vm4, %v987_v51, -inf }
 0x3b7   : > { %992 = vmax.xlane.f32.xlu0 %v991_v53 }
 0x3cd   : > { %1238 = vrot.lane.b32.xlu0 %v912_v46, %s1887_s8  ;;  %s1418_s8 = scalar_lea.sflag [#allocation5], %s232_s13 }
 0x3ec   : > { %521 = vadd.xlane.f32.xlu0 %v520_v54 }
 0x444   : > { %v993_v55 = vpop.xlane.xlu0 %992 }
 0x445   : > { %v994_v56 = vsub.f32 %v987_v51, %v993_v55 }
 0x447   : > { %v995_v57 = vmul.f32 1.442695, %v994_v56 }
 0x448   : > { %v1239_v61 = vpop.permute.xlu0 %1238 }
 0x449   : > { %1790 = vpow2.f32 %v995_v57 }
 0x453   : > { %v1791_v59 = vpop.eup %1790 }
 0x454   : > { %1645 = vmatmul.mubr.msk.f32.vlgmr.msra.gmra.mrb[10].mxu1 %vm513_vm4, %v1791_v59  ;;  %v997_v4 = vsel %vm513_vm4, %v1791_v59, 0.0 }
 0x455   : > { %1659 = vmatpush3.xpose.msk.msra.mxu1 %vm436_vm2, %v1152_v58  ;;  %1660 = vmatprep.mubr.msk.f32.mxu1 %vm1883_vm0, %v1882_v7 }
 0x456   : > { %1663 = vmatprep.subr.mxu1 %v1882_v7 }
 0x458   : > { %1661 = vmatmul.mubr.msk.f32.vlgmr.msra.gmra.mrb[12].mxu1 %vm436_vm2, %v1150_v60 }
 0x459   : > { %1664 = vmatpush3.msra.mxu1 %v1239_v61  ;;  %1665 = vmatprep.mubr.msk.f32.mxu1 %vm1883_vm0, %v1882_v7 }
 0x479   : > { %v522_v16 = vpop.xlane.xlu0 %521 }
 0x527   : > { %v2071_v62 = vpop.f32.mrb[10].mxu1 }
 0x528   : > { %v1646_v63 = vpop.f32.mrb[11].mxu1 }
 0x52b   : > { %v1223_v0 = vpop.f32.mrb[12].mxu1 }
 0x52c   : > { %v1662_v1 = vpop.f32.mrb[13].mxu1  ;;  %v1227_v2 = vsel %vm513_vm4, %v1223_v0, -inf }
 0x52d   : > { %1228 = vmax.xlane.f32.xlu1 %v1227_v2 }
 0x531   : > { %686 = vadd.xlane.f32.xlu1 %v685_v3 }
 0x535   : > { %998 = vadd.xlane.f32.xlu1 %v997_v4 }
 0x5ba   : > { %v1229_v12 = vpop.xlane.xlu1 %1228 }
 0x5bb   : > { %v1230_v13 = vsub.f32 %v1223_v0, %v1229_v12 }
 0x5bd   : > { %v1231_v14 = vmul.f32 1.442695, %v1230_v13 }
 0x5be   : > { %v687_v15 = vpop.xlane.xlu1 %686 }
 0x5bf   : > { %1792 = vpow2.f32 %v1231_v14 }
 0x5c0   : > { %1794 = vrcp.f32 %v687_v15 }
 0x5c1   : > { %1796 = vrcp.f32 %v522_v16 }
 0x5c2   : > { %v999_v25 = vpop.xlane.xlu1 %998 }
 0x5c3   : > { %1798 = vrcp.f32 %v999_v25 }
 0x5c9   : > { %v1793_v20 = vpop.eup %1792 }
 0x5ca   : > { %v1795_v21 = vpop.eup %1794  ;;  %1666 = vmatmul.mubr.msk.f32.vlgmr.msra.gmra.mrb[14].mxu1 %vm513_vm4, %v1793_v20  ;;  %v1233_v22 = vsel %vm513_vm4, %v1793_v20, 0.0 }
 0x5cb   : > { %v765_v24 = vmul.f32 %v1795_v21, %v761_v49  ;;  %1234 = vadd.xlane.f32.xlu1 %v1233_v22  ;;  %v1797_v31 = vpop.eup %1796 }
 0x5cc   : > { %v600_v33 = vmul.f32 %v1797_v31, %v2058_v47 }
 0x5cd   : > { %1624 = vmatmul.mubr.msk.f32.vlgmr.msra.gmra.mrb[4].mxu0 %vm255_vm1, %v765_v24  ;;  %v1799_v37 = vpop.eup %1798 }
 0x5ce   : > { %1701 = vmatpush3.bf16.msra.mxu0 %v1700_v23  ;;  %1634 = vmatprep.mubr.msk.f32.mxu0 %vm1883_vm0, %v1882_v7  ;;  %v1074_v41 = vmul.f32 %v1799_v37, %v2071_v62 }
 0x5cf   : > { %1702 = vmatprep.subr.bf16.mxu0 %v1884_v17 }
 0x5d2   : > { %1704 = vmatpush3.bf16.msra.mxu0 %v1703_v28 }
 0x5d3   : > { %1705 = vmatprep.subr.bf16.mxu0 %v1884_v17 }
 0x5d5   : > { %1635 = vmatmul.mubr.msk.f32.vlgmr.msra.gmra.mrb[4].mxu0 %vm255_vm1, %v600_v33 }
 0x5d6   : > { %1707 = vmatpush3.bf16.msra.mxu0 %v1706_v32  ;;  %1655 = vmatprep.mubr.msk.f32.mxu0 %vm1883_vm0, %v1882_v7 }
 0x5d7   : > { %1708 = vmatprep.subr.bf16.mxu0 %v1884_v17 }
 0x5da   : > { %1710 = vmatpush3.bf16.msra.mxu0 %v1709_v36 }
 0x5db   : > { %1711 = vmatprep.subr.bf16.mxu0 %v1884_v17 }
 0x5dd   : > { %1656 = vmatmul.mubr.msk.f32.vlgmr.msra.gmra.mrb[4].mxu0 %vm255_vm1, %v1074_v41 }
 0x5de   : > { %1713 = vmatpush3.bf16.msra.mxu0 %v1712_v40  ;;  %1676 = vmatprep.mubr.msk.f32.mxu0 %vm1883_vm0, %v1882_v7  ;;  %v1538_v7 = vld [vmem:[%s2206_s4] ss:$0 sm:$0xff] }
 0x5df   : > { %1714 = vmatprep.subr.bf16.mxu0 %v1884_v17 }
 0x5e2   : > { %1716 = vmatpush3.bf16.msra.mxu0 %v1715_v44 }
 0x658   : > { %v1235_v45 = vpop.xlane.xlu1 %1234 }
 0x659   : > { %1800 = vrcp.f32 %v1235_v45 }
 0x663   : > { %v1801_v46 = vpop.eup %1800 }
 0x69d   : > { %v1310_v47 = vpop.f32.mrb[14].mxu1 }
 0x69e   : > { %v1314_v48 = vmul.f32 %v1801_v46, %v1310_v47  ;;  %v1667_v49 = vpop.f32.mrb[15].mxu1 }
 0x6a0   : > { %1677 = vmatmul.mubr.msk.f32.vlgmr.msra.gmra.mrb[4].mxu0 %vm255_vm1, %v1314_v48 }
 0x773   : > { %v1384_v50 = vpop.f32.mrb[4].mxu0 }
 0x774   : > { %1394 = vst.msk [vmem:[#allocation3] sm:$0xff] %vm255_vm1, %v1384_v50  ;;  %v1678_v51 = vpop.f32.mrb[5].mxu0 }
 0x77b   : > { %v1407_v17 = vld [vmem:[#allocation3] sm:$0xff] }
 0x77c   : > { %v1415_v52 = vadd.f32 %v1538_v7, %v1407_v17 }
 0x77e   : > { %1416 = vst.msk [vmem:[%s234_s24] sm:$0xff] %vm255_vm1, %v1415_v52 }
 0x77f   : > { %1815 = shalt.err (!%p1812_p5)
}
 0x780   : > { %s1816_s12 = scalar_lea.hbm %s2154_s7, 128  ;;  %s1820_s15 = scalar_lea.hbm %s2207_s5, 256 }
 0x781   : > { %p1817_p6 = scmp.ne.s32.totalorder %s2154_s7, %s1816_s12  ;;  %p1821_p10 = scmp.lt.u32.totalorder %s2154_s7, %s2207_s5 }
 0x782   : > { %p1822_p11 = scmp.lt.u32.totalorder %s1820_s15, %s1816_s12  ;;  %p1824_p13 = scmp.lt.u32.totalorder %s1816_s12, %s2154_s7 }
 0x783   : > { %p1818_p7 = pnand %p1817_p6, %p1961_p4 }
 0x784   : > { %p1823_p12 = por %p1822_p11, %p1821_p10 }
 0x785   : > { %p1819_p9 = pneg %p1818_p7 }
 0x786   : > { %p1825_p0 = por %p1824_p13, %p1823_p12 }
 0x788   : > { %p1826_p1 = pnand %p1825_p0, %p1819_p9 }
 0x78a   : > { %1829 = shalt.err (!%p1826_p1)
}
 0x78b   : > { %1723 = dma.vmem_to_hbm [thread:$0]  (%p1961_p4), %s2156_s25, 128, %s2154_s7, %s1418_s8  }
 0x78c PF: > { %p1729_p2 = scmp.ge.s32.totalorder %s1880_s23, 2  ;;  %s1443_s24 = sand.u32 1, %s1860_s18  }
 0x78d   : > { %s1444_s27 = scalar_lea.sflag [#allocation5], %s1443_s24 }
 0x78e   : > { %p1726_p3 = pnand %p1729_p2, %p1968_p8 }
 0x790   : > { %1855 = dma.done.wait (!%p1726_p3), %s1444_s27, 128  }
 0x791   : > { %1857 = vsyncadd (!%p1726_p3), %s1444_s27, 4294967168  ;;  %s18_s23 = sadd.s32 1, %s1880_s23   ;;  %s2210_s18 = smov %s1864_s19 }
 0x792   : > { %p15_p5 = scmp.ge.s32.totalorder %s18_s23, 4   ;;  %s2211_s19 = smov %s1868_s20 }
 0x793   : > { %s2212_s20 = smov %s1974_s6  ;;  %s2213_s21 = smov %s1876_s22 }
 0x794   : > { %s2214_s22 = smov %s2216_s26  ;;  %17 = sbr.rel (!%p15_p5) target bundleno = 4 (0x4), region = 97 }
 0x79b   :  { %1449 = vsyncpa [#allocation5], 1 }
 0x79c   :  { %1451 = vsyncpa [#allocation5 + $0x1], 1 }

</bundles_post_ra>
